<compile_context>
chip_gen: v7x
topology: tpu7x:2x2x1
jax: 0.10.0
libtpu: 0.0.40
codegen_flags: <defaults>
</compile_context>

<pallas_src>
import numpy as np
import jax
import jax.numpy as jnp
from jax import lax
from jax.experimental import pallas as pl
from jax.experimental.pallas import tpu as pltpu

# ---------------- configuration ----------------
N_BATCH = 2
IN_CH = 8                  # DoubleConv in_channels (= channels after concat)
OUT_CH = 8                 # DoubleConv out_channels
MID = IN_CH // 2           # DoubleConv mid channels (= 4)
MID_PAD = 8                # mid padded to a full sublane tile
C_UP = IN_CH // 2          # channels of x1 (deep feature, gets upsampled)
C_SKIP = IN_CH - C_UP      # channels of x2 (skip connection)
H1, W1 = 8, 8              # x1 spatial
H2, W2 = 16, 16            # x2 spatial (= output spatial)
P1 = H1 * W1               # 64
P2 = H2 * W2               # 256  (flattened spatial per image -> lane axis)
BN_EPS = 1e-5

_TAPS = [(dh, dw) for dh in (-1, 0, 1) for dw in (-1, 0, 1)]


# ---------------- Pallas kernel ----------------
def upsample_block_kernel(x1_ref, x2_ref, up_ref, mask_ref,
                          w1_ref, w2_ref, bias_ref, out_ref):
    # pb = lanes handled by this grid step (512 fused, 256 per-batch on v7x).
    pb = out_ref.shape[-1]

    # ---- load every parameter exactly once (hoisted loads) ----
    x1 = x1_ref[...]                      # (C_UP, N*P1) f32
    up = up_ref[...]                      # (N*P1, pb)   bf16, block-diagonal
    w1 = w1_ref[...]                      # (MID_PAD, 9*IN_CH)  bf16, BN-scaled
    w2 = w2_ref[...]                      # (OUT_CH, 9*MID_PAD) bf16, BN-scaled
    bias = bias_ref[...]                  # (MID_PAD, 2) f32 = [b1 | b2]
    b1 = bias[:, 0:1]
    b2 = bias[:, 1:2]
    masks = mask_ref[...]                 # (8, pb) f32, host-precomputed

    def tap_stack(t):
        # t: (C, pb) f32 -> (9*C, pb) bf16; the 9 zero-padded 3x3 taps, shifted
        # fully in-register with pltpu.roll on the lane axis.  Host-built masks
        # (pos % 256) zero every lane a roll would wrap across an image/batch
        # boundary.  Cast to bf16 once, after the aligned f32 sublane concat.
        pieces = []
        mi = 0
        for dh, dw in _TAPS:
            s = dh * W2 + dw              # read in_flat[p + s]
            if s == 0:
                pieces.append(t)
            else:
                m = masks[mi:mi + 1, :]
                mi += 1
                pieces.append(pltpu.roll(t, (-s) % pb, axis=1) * m)
        return jnp.concatenate(pieces, axis=0).astype(jnp.bfloat16)

    # ---- bilinear upsample (align_corners=True) + F.pad as one matmul ----
    x1_up = jnp.dot(x1.astype(jnp.bfloat16), up,
                    preferred_element_type=jnp.float32)          # (C_UP, pb)

    # ---- torch.cat([x2, x1_up], dim=channel) ----
    xcat = jnp.concatenate([x2_ref[...], x1_up], axis=0)         # (IN_CH, pb)

    # ---- DoubleConv: (conv3x3 + bias + ReLU) x 2, BN folded into w/b ----
    h = jnp.dot(w1, tap_stack(xcat), preferred_element_type=jnp.float32)
    h = jnp.maximum(h + b1, 0.0)                                 # (MID_PAD, pb)

    o = jnp.dot(w2, tap_stack(h), preferred_element_type=jnp.float32)
    o = jnp.maximum(o + b2, 0.0)                                 # (OUT_CH, pb)

    out_ref[...] = o.astype(out_ref.dtype)


# ---------------- host-side parameter packing ----------------
def _interp_matrix(n_out, n_in):
    # 1-D linear interpolation matrix, align_corners=True.
    a = np.zeros((n_out, n_in), np.float32)
    for i in range(n_out):
        src = i * (n_in - 1) / (n_out - 1) if n_out > 1 else 0.0
        i0 = min(int(np.floor(src)), n_in - 1)
        i1 = min(i0 + 1, n_in - 1)
        f = src - i0
        a[i, i0] += 1.0 - f
        a[i, i1] += f
    return a


def _build_upsample_pad_matrix(h_in, w_in, h_out, w_out):
    # Linear map (h_in*w_in) -> (h_out*w_out): bilinear 2x upsample with
    # align_corners=True, followed by the F.pad placement used in the module.
    hu, wu = 2 * h_in, 2 * w_in
    a_h = _interp_matrix(hu, h_in)
    a_w = _interp_matrix(wu, w_in)
    core = np.einsum("ip,jq->pqij", a_h, a_w).reshape(h_in * w_in, hu, wu)
    d_y, d_x = h_out - hu, w_out - wu
    assert d_y >= 0 and d_x >= 0
    top, left = d_y // 2, d_x // 2
    mat = np.zeros((h_in * w_in, h_out, w_out), np.float32)
    mat[:, top:top + hu, left:left + wu] = core
    return mat.reshape(h_in * w_in, h_out * w_out)


def _build_upsample_pad_matrix_batched():
    # Block-diagonal (N*P1, N*P2) so the upsample of both lane-fused batches is
    # one matmul.  bf16 operand for the MXU (zeros stay exactly zero).
    single = _build_upsample_pad_matrix(H1, W1, H2, W2)          # (P1, P2)
    bd = np.zeros((N_BATCH * P1, N_BATCH * P2), np.float32)
    for b in range(N_BATCH):
        bd[b * P1:(b + 1) * P1, b * P2:(b + 1) * P2] = single
    return jnp.asarray(bd, dtype=jnp.bfloat16)


def _build_tap_masks():
    # Boundary masks for the 8 off-center taps, built per image (pos % P2) so
    # they are valid for both the 256-lane and 512-lane (batch-fused) layouts.
    q = np.arange(N_BATCH * P2) % P2
    hh = q // W2
    ww = q % W2
    rows = []
    for dh, dw in _TAPS:
        if dh == 0 and dw == 0:
            continue
        m = np.ones(N_BATCH * P2, np.float32)
        if dh == -1:
            m *= (hh > 0).astype(np.float32)
        elif dh == 1:
            m *= (hh < H2 - 1).astype(np.float32)
        if dw == -1:
            m *= (ww > 0).astype(np.float32)
        elif dw == 1:
            m *= (ww < W2 - 1).astype(np.float32)
        rows.append(m)
    return jnp.asarray(np.stack(rows, axis=0), dtype=jnp.float32)  # (8, 512)


def _pack_conv_params(p):
    # Inference-mode BN: scale folded into the conv weights, shift kept as bias.
    s1 = p["g1"] / jnp.sqrt(p["v1"] + BN_EPS)                     # (MID,)
    t1 = p["beta1"] + (p["b1"] - p["m1"]) * s1
    s2 = p["g2"] / jnp.sqrt(p["v2"] + BN_EPS)                     # (OUT_CH,)
    t2 = p["beta2"] + (p["b2"] - p["m2"]) * s2

    # Tap-stacked conv weights matching the kernel's K order: K = tap*C + ci.
    w1 = jnp.transpose(p["w1"], (0, 2, 3, 1)).reshape(MID, 9 * IN_CH)
    w1 = w1 * s1[:, None]
    w1 = jnp.pad(w1, ((0, MID_PAD - MID), (0, 0)))                # (8, 72)

    w2 = jnp.transpose(p["w2"], (0, 2, 3, 1))                     # (O,3,3,MID)
    w2 = jnp.pad(w2, ((0, 0), (0, 0), (0, 0), (0, MID_PAD - MID)))
    w2 = w2.reshape(OUT_CH, 9 * MID_PAD) * s2[:, None]            # (8, 72)

    b1 = jnp.pad(t1, (0, MID_PAD - MID))
    bias = jnp.stack([b1, t2], axis=1).astype(jnp.float32)        # (8, 2)
    return w1.astype(jnp.bfloat16), w2.astype(jnp.bfloat16), bias


# ---------------- wrapper ----------------
def _has_two_tensorcores():
    # v7x is the only generation with 2 TensorCores per chip: split the two
    # batches across cores there; fuse them into one 512-lane step elsewhere.
    try:
        kind = jax.devices()[0].device_kind.lower()
    except Exception:
        return False
    return ("v7" in kind) or ("7x" in kind)


def upsample_block(x1_nchw, x2_nchw, p, *, split_batches=None):
    if split_batches is None:
        split_batches = _has_two_tensorcores()

    n, c_up, h1, w1 = x1_nchw.shape
    _, c_skip, h2, w2 = x2_nchw.shape
    assert (n, c_up, h1, w1) == (N_BATCH, C_UP, H1, W1)
    assert (c_skip, h2, w2) == (C_SKIP, H2, W2)

    steps = N_BATCH if split_batches else 1
    pb = (N_BATCH // steps) * P2          # lanes per grid step (256 or 512)

    # Layout plumbing outside the kernel: channels on sublanes, batches fused
    # side-by-side on the flattened-spatial lane axis.
    x1_flat = (jnp.transpose(x1_nchw.reshape(n, C_UP, P1), (1, 0, 2))
               .reshape(C_UP, N_BATCH * P1).astype(jnp.float32))
    x2_flat = (jnp.transpose(x2_nchw.reshape(n, C_SKIP, P2), (1, 0, 2))
               .reshape(C_SKIP, N_BATCH * P2).astype(jnp.float32))

    w1_p, w2_p, bias = _pack_conv_params(p)
    upmat = _build_upsample_pad_matrix_batched()
    masks = _build_tap_masks()

    out_flat = pl.pallas_call(
        upsample_block_kernel,
        out_shape=jax.ShapeDtypeStruct((OUT_CH, N_BATCH * P2), jnp.float32),
        grid=(steps,),
        in_specs=[
            pl.BlockSpec((C_UP, N_BATCH * P1), lambda b: (0, 0)),   # x1 (full)
            pl.BlockSpec((C_SKIP, pb), lambda b: (0, b)),           # x2
            pl.BlockSpec((N_BATCH * P1, pb), lambda b: (0, b)),     # upmat cols
            pl.BlockSpec((8, pb), lambda b: (0, b)),                # tap masks
            pl.BlockSpec((MID_PAD, 9 * IN_CH), lambda b: (0, 0)),   # w1
            pl.BlockSpec((OUT_CH, 9 * MID_PAD), lambda b: (0, 0)),  # w2
            pl.BlockSpec((MID_PAD, 2), lambda b: (0, 0)),           # biases
        ],
        out_specs=pl.BlockSpec((OUT_CH, pb), lambda b: (0, b)),
        compiler_params=pltpu.CompilerParams(
            dimension_semantics=("parallel",)),
    )(x1_flat, x2_flat, upmat, masks, w1_p, w2_p, bias)

    out = jnp.transpose(out_flat.reshape(OUT_CH, N_BATCH, P2), (1, 0, 2))
    return out.reshape(N_BATCH, OUT_CH, H2, W2)


# ---------------- deterministic parameter init ----------------
def make_params(key):
    ks = jax.random.split(key, 12)
    nrm = lambda k, s, sc: jax.random.normal(k, s, dtype=jnp.float32) * sc
    uni = lambda k, s: jax.random.uniform(k, s, jnp.float32, 0.5, 1.5)
    return {
        "w1": nrm(ks[0], (MID, IN_CH, 3, 3), 0.25),
        "b1": nrm(ks[1], (MID,), 0.1),
        "g1": uni(ks[2], (MID,)),
        "beta1": nrm(ks[3], (MID,), 0.1),
        "m1": nrm(ks[4], (MID,), 0.1),
        "v1": uni(ks[5], (MID,)),
        "w2": nrm(ks[6], (OUT_CH, MID, 3, 3), 0.25),
        "b2": nrm(ks[7], (OUT_CH,), 0.1),
        "g2": uni(ks[8], (OUT_CH,)),
        "beta2": nrm(ks[9], (OUT_CH,), 0.1),
        "m2": nrm(ks[10], (OUT_CH,), 0.1),
        "v2": uni(ks[11], (OUT_CH,)),
    }


# ---------------- pure-JAX reference (same math, f32, no Pallas) ----------------
def ref_forward(x1, x2, p):
    # bilinear upsample, scale_factor=2, align_corners=True
    n, c, hi, wi = x1.shape
    ho, wo = 2 * hi, 2 * wi
    hs = jnp.linspace(0.0, hi - 1.0, ho)
    ws = jnp.linspace(0.0, wi - 1.0, wo)
    h0 = jnp.clip(jnp.floor(hs).astype(jnp.int32), 0, hi - 1)
    h1 = jnp.clip(h0 + 1, 0, hi - 1)
    hf = hs - h0.astype(jnp.float32)
    w0 = jnp.clip(jnp.floor(ws).astype(jnp.int32), 0, wi - 1)
    w1_ = jnp.clip(w0 + 1, 0, wi - 1)
    wf = ws - w0.astype(jnp.float32)
    xh = (x1[:, :, h0, :] * (1.0 - hf)[None, None, :, None]
          + x1[:, :, h1, :] * hf[None, None, :, None])
    xu = (xh[:, :, :, w0] * (1.0 - wf)[None, None, None, :]
          + xh[:, :, :, w1_] * wf[None, None, None, :])
    # F.pad to match x2
    d_y = x2.shape[2] - xu.shape[2]
    d_x = x2.shape[3] - xu.shape[3]
    xu = jnp.pad(xu, ((0, 0), (0, 0),
                      (d_y // 2, d_y - d_y // 2), (d_x // 2, d_x - d_x // 2)))
    x = jnp.concatenate([x2, xu], axis=1)

    def conv3x3(t, w, b):
        o = lax.conv_general_dilated(t, w, (1, 1), ((1, 1), (1, 1)),
                                     dimension_numbers=("NCHW", "OIHW", "NCHW"))
        return o + b[None, :, None, None]

    def bn(t, g, beta, m, v):
        inv = g / jnp.sqrt(v + BN_EPS)
        return (t - m[None, :, None, None]) * inv[None, :, None, None] \
            + beta[None, :, None, None]

    h = jax.nn.relu(bn(conv3x3(x, p["w1"], p["b1"]),
                       p["g1"], p["beta1"], p["m1"], p["v1"]))
    o = jax.nn.relu(bn(conv3x3(h, p["w2"], p["b2"]),
                       p["g2"], p["beta2"], p["m2"], p["v2"]))
    return o


if __name__ == "__main__":
    key = jax.random.PRNGKey(0)
    k1, k2, kp = jax.random.split(key, 3)
    x1 = jax.random.normal(k1, (N_BATCH, C_UP, H1, W1), dtype=jnp.float32)
    x2 = jax.random.normal(k2, (N_BATCH, C_SKIP, H2, W2), dtype=jnp.float32)
    params = make_params(kp)

    ref = jax.block_until_ready(ref_forward(x1, x2, params))

    # Check both code paths (single fused 512-lane step for v5e/v6e, 2-way
    # parallel grid for dual-TC v7x) plus the auto-selected one for this device.
    for split in (False, True, None):
        out = jax.block_until_ready(
            upsample_block(x1, x2, params, split_batches=split))
        assert out.shape == (N_BATCH, OUT_CH, H2, W2), out.shape
        # bf16 MXU operands with f32 accumulation -> slightly looser tolerance.
        np.testing.assert_allclose(np.asarray(out), np.asarray(ref),
                                   rtol=3e-2, atol=3e-2)
    print("KERNEL_OK")
</pallas_src>

<mosaic_0001>
module attributes {stable_mosaic.version = 11 : i64} {
  func.func @upsample_block_kernel(%arg0: i32, %arg1: memref<4x128xf32, #tpu.memory_space<vmem>>, %arg2: memref<4x512xf32, #tpu.memory_space<vmem>>, %arg3: memref<128x512xbf16, #tpu.memory_space<vmem>>, %arg4: memref<8x512xf32, #tpu.memory_space<vmem>>, %arg5: memref<8x72xbf16, #tpu.memory_space<vmem>>, %arg6: memref<8x72xbf16, #tpu.memory_space<vmem>>, %arg7: memref<8x2xf32, #tpu.memory_space<vmem>>, %arg8: memref<8x512xf32, #tpu.memory_space<vmem>>) attributes {dimension_semantics = [#tpu.dimension_semantics<parallel>], iteration_bounds = array<i64: 1>, scalar_prefetch = 0 : i64, scratch_operands = 0 : i64, tpu.core_type = #tpu.core_type<tc>, window_params = [{pipeline_mode = #tpu.pipeline_mode<synchronous>, transform_indices = @transform_0, window_bounds = array<i64: 4, 128>}, {transform_indices = @transform_1, window_bounds = array<i64: 4, 512>}, {transform_indices = @transform_2, window_bounds = array<i64: 128, 512>}, {transform_indices = @transform_3, window_bounds = array<i64: 8, 512>}, {pipeline_mode = #tpu.pipeline_mode<synchronous>, transform_indices = @transform_4, window_bounds = array<i64: 8, 72>}, {pipeline_mode = #tpu.pipeline_mode<synchronous>, transform_indices = @transform_5, window_bounds = array<i64: 8, 72>}, {pipeline_mode = #tpu.pipeline_mode<synchronous>, transform_indices = @transform_6, window_bounds = array<i64: 8, 2>}, {transform_indices = @transform_7, window_bounds = array<i64: 8, 512>}]} {
    %c0 = arith.constant 0 : index
    %c0_0 = arith.constant 0 : index
    %0 = vector.load %arg1[%c0, %c0_0] : memref<4x128xf32, #tpu.memory_space<vmem>>, vector<4x128xf32>
    %c0_1 = arith.constant 0 : index
    %c0_2 = arith.constant 0 : index
    %1 = vector.load %arg3[%c0_1, %c0_2] : memref<128x512xbf16, #tpu.memory_space<vmem>>, vector<128x512xbf16>
    %c0_3 = arith.constant 0 : index
    %c0_4 = arith.constant 0 : index
    %2 = vector.load %arg5[%c0_3, %c0_4] : memref<8x72xbf16, #tpu.memory_space<vmem>>, vector<8x72xbf16>
    %c0_5 = arith.constant 0 : index
    %c0_6 = arith.constant 0 : index
    %3 = vector.load %arg6[%c0_5, %c0_6] : memref<8x72xbf16, #tpu.memory_space<vmem>>, vector<8x72xbf16>
    %c0_7 = arith.constant 0 : index
    %c0_8 = arith.constant 0 : index
    %4 = vector.load %arg7[%c0_7, %c0_8] : memref<8x2xf32, #tpu.memory_space<vmem>>, vector<8x2xf32>
    %5 = vector.extract_strided_slice %4 {offsets = [0, 0], sizes = [8, 1], strides = [1, 1]} : vector<8x2xf32> to vector<8x1xf32>
    %6 = vector.extract_strided_slice %4 {offsets = [0, 1], sizes = [8, 1], strides = [1, 1]} : vector<8x2xf32> to vector<8x1xf32>
    %c0_9 = arith.constant 0 : index
    %c0_10 = arith.constant 0 : index
    %7 = vector.load %arg4[%c0_9, %c0_10] : memref<8x512xf32, #tpu.memory_space<vmem>>, vector<8x512xf32>
    %8 = arith.truncf %0 : vector<4x128xf32> to vector<4x128xbf16>
    %cst = arith.constant dense<0.000000e+00> : vector<4x512xf32>
    %9 = tpu.matmul %8, %1, %cst {dimension_numbers = #tpu.dot_dimension_numbers<[1], [0], [0], [1], [0, 0, 1, 1], [], []>} : vector<4x128xbf16>, vector<128x512xbf16>, vector<4x512xf32> -> vector<4x512xf32>
    %c0_11 = arith.constant 0 : index
    %c0_12 = arith.constant 0 : index
    %10 = vector.load %arg2[%c0_11, %c0_12] : memref<4x512xf32, #tpu.memory_space<vmem>>, vector<4x512xf32>
    %11 = tpu.concatenate %10, %9 in 0 : vector<4x512xf32>, vector<4x512xf32> -> vector<8x512xf32>
    %12 = vector.extract_strided_slice %7 {offsets = [0, 0], sizes = [1, 512], strides = [1, 1]} : vector<8x512xf32> to vector<1x512xf32>
    %c17_i32 = arith.constant 17 : i32
    %13 = tpu.dynamic_rotate %11 by %c17_i32 dim 1 : vector<8x512xf32>, i32 -> vector<8x512xf32>
    %14 = vector.broadcast %12 : vector<1x512xf32> to vector<8x512xf32>
    %15 = arith.mulf %13, %14 : vector<8x512xf32>
    %16 = vector.extract_strided_slice %7 {offsets = [1, 0], sizes = [1, 512], strides = [1, 1]} : vector<8x512xf32> to vector<1x512xf32>
    %c16_i32 = arith.constant 16 : i32
    %17 = tpu.dynamic_rotate %11 by %c16_i32 dim 1 : vector<8x512xf32>, i32 -> vector<8x512xf32>
    %18 = vector.broadcast %16 : vector<1x512xf32> to vector<8x512xf32>
    %19 = arith.mulf %17, %18 : vector<8x512xf32>
    %20 = vector.extract_strided_slice %7 {offsets = [2, 0], sizes = [1, 512], strides = [1, 1]} : vector<8x512xf32> to vector<1x512xf32>
    %c15_i32 = arith.constant 15 : i32
    %21 = tpu.dynamic_rotate %11 by %c15_i32 dim 1 : vector<8x512xf32>, i32 -> vector<8x512xf32>
    %22 = vector.broadcast %20 : vector<1x512xf32> to vector<8x512xf32>
    %23 = arith.mulf %21, %22 : vector<8x512xf32>
    %24 = vector.extract_strided_slice %7 {offsets = [3, 0], sizes = [1, 512], strides = [1, 1]} : vector<8x512xf32> to vector<1x512xf32>
    %c1_i32 = arith.constant 1 : i32
    %25 = tpu.dynamic_rotate %11 by %c1_i32 dim 1 : vector<8x512xf32>, i32 -> vector<8x512xf32>
    %26 = vector.broadcast %24 : vector<1x512xf32> to vector<8x512xf32>
    %27 = arith.mulf %25, %26 : vector<8x512xf32>
    %28 = vector.extract_strided_slice %7 {offsets = [4, 0], sizes = [1, 512], strides = [1, 1]} : vector<8x512xf32> to vector<1x512xf32>
    %c511_i32 = arith.constant 511 : i32
    %29 = tpu.dynamic_rotate %11 by %c511_i32 dim 1 : vector<8x512xf32>, i32 -> vector<8x512xf32>
    %30 = vector.broadcast %28 : vector<1x512xf32> to vector<8x512xf32>
    %31 = arith.mulf %29, %30 : vector<8x512xf32>
    %32 = vector.extract_strided_slice %7 {offsets = [5, 0], sizes = [1, 512], strides = [1, 1]} : vector<8x512xf32> to vector<1x512xf32>
    %c497_i32 = arith.constant 497 : i32
    %33 = tpu.dynamic_rotate %11 by %c497_i32 dim 1 : vector<8x512xf32>, i32 -> vector<8x512xf32>
    %34 = vector.broadcast %32 : vector<1x512xf32> to vector<8x512xf32>
    %35 = arith.mulf %33, %34 : vector<8x512xf32>
    %36 = vector.extract_strided_slice %7 {offsets = [6, 0], sizes = [1, 512], strides = [1, 1]} : vector<8x512xf32> to vector<1x512xf32>
    %c496_i32 = arith.constant 496 : i32
    %37 = tpu.dynamic_rotate %11 by %c496_i32 dim 1 : vector<8x512xf32>, i32 -> vector<8x512xf32>
    %38 = vector.broadcast %36 : vector<1x512xf32> to vector<8x512xf32>
    %39 = arith.mulf %37, %38 : vector<8x512xf32>
    %40 = vector.extract_strided_slice %7 {offsets = [7, 0], sizes = [1, 512], strides = [1, 1]} : vector<8x512xf32> to vector<1x512xf32>
    %c495_i32 = arith.constant 495 : i32
    %41 = tpu.dynamic_rotate %11 by %c495_i32 dim 1 : vector<8x512xf32>, i32 -> vector<8x512xf32>
    %42 = vector.broadcast %40 : vector<1x512xf32> to vector<8x512xf32>
    %43 = arith.mulf %41, %42 : vector<8x512xf32>
    %44 = tpu.concatenate %15, %19, %23, %27, %11, %31, %35, %39, %43 in 0 : vector<8x512xf32>, vector<8x512xf32>, vector<8x512xf32>, vector<8x512xf32>, vector<8x512xf32>, vector<8x512xf32>, vector<8x512xf32>, vector<8x512xf32>, vector<8x512xf32> -> vector<72x512xf32>
    %45 = arith.truncf %44 : vector<72x512xf32> to vector<72x512xbf16>
    %cst_13 = arith.constant dense<0.000000e+00> : vector<8x512xf32>
    %46 = tpu.matmul %2, %45, %cst_13 {dimension_numbers = #tpu.dot_dimension_numbers<[1], [0], [0], [1], [0, 0, 1, 1], [], []>} : vector<8x72xbf16>, vector<72x512xbf16>, vector<8x512xf32> -> vector<8x512xf32>
    %47 = vector.broadcast %5 : vector<8x1xf32> to vector<8x512xf32>
    %48 = arith.addf %46, %47 : vector<8x512xf32>
    %cst_14 = arith.constant 0.000000e+00 : f32
    %49 = vector.broadcast %cst_14 : f32 to vector<8x512xf32>
    %50 = arith.maximumf %48, %49 : vector<8x512xf32>
    %51 = vector.extract_strided_slice %7 {offsets = [0, 0], sizes = [1, 512], strides = [1, 1]} : vector<8x512xf32> to vector<1x512xf32>
    %c17_i32_15 = arith.constant 17 : i32
    %52 = tpu.dynamic_rotate %50 by %c17_i32_15 dim 1 : vector<8x512xf32>, i32 -> vector<8x512xf32>
    %53 = vector.broadcast %51 : vector<1x512xf32> to vector<8x512xf32>
    %54 = arith.mulf %52, %53 : vector<8x512xf32>
    %55 = vector.extract_strided_slice %7 {offsets = [1, 0], sizes = [1, 512], strides = [1, 1]} : vector<8x512xf32> to vector<1x512xf32>
    %c16_i32_16 = arith.constant 16 : i32
    %56 = tpu.dynamic_rotate %50 by %c16_i32_16 dim 1 : vector<8x512xf32>, i32 -> vector<8x512xf32>
    %57 = vector.broadcast %55 : vector<1x512xf32> to vector<8x512xf32>
    %58 = arith.mulf %56, %57 : vector<8x512xf32>
    %59 = vector.extract_strided_slice %7 {offsets = [2, 0], sizes = [1, 512], strides = [1, 1]} : vector<8x512xf32> to vector<1x512xf32>
    %c15_i32_17 = arith.constant 15 : i32
    %60 = tpu.dynamic_rotate %50 by %c15_i32_17 dim 1 : vector<8x512xf32>, i32 -> vector<8x512xf32>
    %61 = vector.broadcast %59 : vector<1x512xf32> to vector<8x512xf32>
    %62 = arith.mulf %60, %61 : vector<8x512xf32>
    %63 = vector.extract_strided_slice %7 {offsets = [3, 0], sizes = [1, 512], strides = [1, 1]} : vector<8x512xf32> to vector<1x512xf32>
    %c1_i32_18 = arith.constant 1 : i32
    %64 = tpu.dynamic_rotate %50 by %c1_i32_18 dim 1 : vector<8x512xf32>, i32 -> vector<8x512xf32>
    %65 = vector.broadcast %63 : vector<1x512xf32> to vector<8x512xf32>
    %66 = arith.mulf %64, %65 : vector<8x512xf32>
    %67 = vector.extract_strided_slice %7 {offsets = [4, 0], sizes = [1, 512], strides = [1, 1]} : vector<8x512xf32> to vector<1x512xf32>
    %c511_i32_19 = arith.constant 511 : i32
    %68 = tpu.dynamic_rotate %50 by %c511_i32_19 dim 1 : vector<8x512xf32>, i32 -> vector<8x512xf32>
    %69 = vector.broadcast %67 : vector<1x512xf32> to vector<8x512xf32>
    %70 = arith.mulf %68, %69 : vector<8x512xf32>
    %71 = vector.extract_strided_slice %7 {offsets = [5, 0], sizes = [1, 512], strides = [1, 1]} : vector<8x512xf32> to vector<1x512xf32>
    %c497_i32_20 = arith.constant 497 : i32
    %72 = tpu.dynamic_rotate %50 by %c497_i32_20 dim 1 : vector<8x512xf32>, i32 -> vector<8x512xf32>
    %73 = vector.broadcast %71 : vector<1x512xf32> to vector<8x512xf32>
    %74 = arith.mulf %72, %73 : vector<8x512xf32>
    %75 = vector.extract_strided_slice %7 {offsets = [6, 0], sizes = [1, 512], strides = [1, 1]} : vector<8x512xf32> to vector<1x512xf32>
    %c496_i32_21 = arith.constant 496 : i32
    %76 = tpu.dynamic_rotate %50 by %c496_i32_21 dim 1 : vector<8x512xf32>, i32 -> vector<8x512xf32>
    %77 = vector.broadcast %75 : vector<1x512xf32> to vector<8x512xf32>
    %78 = arith.mulf %76, %77 : vector<8x512xf32>
    %79 = vector.extract_strided_slice %7 {offsets = [7, 0], sizes = [1, 512], strides = [1, 1]} : vector<8x512xf32> to vector<1x512xf32>
    %c495_i32_22 = arith.constant 495 : i32
    %80 = tpu.dynamic_rotate %50 by %c495_i32_22 dim 1 : vector<8x512xf32>, i32 -> vector<8x512xf32>
    %81 = vector.broadcast %79 : vector<1x512xf32> to vector<8x512xf32>
    %82 = arith.mulf %80, %81 : vector<8x512xf32>
    %83 = tpu.concatenate %54, %58, %62, %66, %50, %70, %74, %78, %82 in 0 : vector<8x512xf32>, vector<8x512xf32>, vector<8x512xf32>, vector<8x512xf32>, vector<8x512xf32>, vector<8x512xf32>, vector<8x512xf32>, vector<8x512xf32>, vector<8x512xf32> -> vector<72x512xf32>
    %84 = arith.truncf %83 : vector<72x512xf32> to vector<72x512xbf16>
    %cst_23 = arith.constant dense<0.000000e+00> : vector<8x512xf32>
    %85 = tpu.matmul %3, %84, %cst_23 {dimension_numbers = #tpu.dot_dimension_numbers<[1], [0], [0], [1], [0, 0, 1, 1], [], []>} : vector<8x72xbf16>, vector<72x512xbf16>, vector<8x512xf32> -> vector<8x512xf32>
    %86 = vector.broadcast %6 : vector<8x1xf32> to vector<8x512xf32>
    %87 = arith.addf %85, %86 : vector<8x512xf32>
    %cst_24 = arith.constant 0.000000e+00 : f32
    %88 = vector.broadcast %cst_24 : f32 to vector<8x512xf32>
    %89 = arith.maximumf %87, %88 : vector<8x512xf32>
    %c0_25 = arith.constant 0 : index
    %c0_26 = arith.constant 0 : index
    %90 = vector.load %arg8[%c0_25, %c0_26] : memref<8x512xf32, #tpu.memory_space<vmem>>, vector<8x512xf32>
    tpu.vector_store %arg8[%c0_25, %c0_26], %89 {strides = array<i32>} : memref<8x512xf32, #tpu.memory_space<vmem>>, vector<8x512xf32>,
    return
  }
  func.func @transform_0(%arg0: i32) -> (i32, i32) {
    %c0_i32 = arith.constant 0 : i32
    %c0_i32_0 = arith.constant 0 : i32
    %c0_i32_1 = arith.constant 0 : i32
    return %c0_i32, %c0_i32_0 : i32, i32
  }
  func.func @transform_1(%arg0: i32) -> (i32, i32) {
    %c0_i32 = arith.constant 0 : i32
    %c0_i32_0 = arith.constant 0 : i32
    return %c0_i32, %arg0 : i32, i32
  }
  func.func @transform_2(%arg0: i32) -> (i32, i32) {
    %c0_i32 = arith.constant 0 : i32
    %c0_i32_0 = arith.constant 0 : i32
    return %c0_i32, %arg0 : i32, i32
  }
  func.func @transform_3(%arg0: i32) -> (i32, i32) {
    %c0_i32 = arith.constant 0 : i32
    %c0_i32_0 = arith.constant 0 : i32
    return %c0_i32, %arg0 : i32, i32
  }
  func.func @transform_4(%arg0: i32) -> (i32, i32) {
    %c0_i32 = arith.constant 0 : i32
    %c0_i32_0 = arith.constant 0 : i32
    %c0_i32_1 = arith.constant 0 : i32
    return %c0_i32, %c0_i32_0 : i32, i32
  }
  func.func @transform_5(%arg0: i32) -> (i32, i32) {
    %c0_i32 = arith.constant 0 : i32
    %c0_i32_0 = arith.constant 0 : i32
    %c0_i32_1 = arith.constant 0 : i32
    return %c0_i32, %c0_i32_0 : i32, i32
  }
  func.func @transform_6(%arg0: i32) -> (i32, i32) {
    %c0_i32 = arith.constant 0 : i32
    %c0_i32_0 = arith.constant 0 : i32
    %c0_i32_1 = arith.constant 0 : i32
    return %c0_i32, %c0_i32_0 : i32, i32
  }
  func.func @transform_7(%arg0: i32) -> (i32, i32) {
    %c0_i32 = arith.constant 0 : i32
    %c0_i32_0 = arith.constant 0 : i32
    return %c0_i32, %arg0 : i32, i32
  }
}

</mosaic_0001>

<bundles_post_ra>
// kernel: tpu_custom_call.1
= control target key start
LH: loop header
LB: loop body
LE: loop exit
PB: predicated region body
PF: predicated region fallthrough
CT: control target
= control target key end

     0   :  { %12 = vsyncpa [#allocation3], 0  ;;  %s1931_s0 = inlined_call_operand.vmem [shape: f32[4,128], index: 0, kind: input, shape index: {}]   ;;  %s1932_s1 = inlined_call_operand.hbm [shape: f32[4,512], index: 1, kind: input, shape index: {}]   ;;  %s1933_s2 = inlined_call_operand.hbm [shape: bf16[128,512], index: 2, kind: input, shape index: {}]   ;;  %s1934_s3 = inlined_call_operand.hbm [shape: f32[8,512], index: 3, kind: input, shape index: {}]   ;;  %s1935_s4 = inlined_call_operand.vmem [shape: bf16[8,72], index: 4, kind: input, shape index: {}]   ;;  %s1936_s5 = inlined_call_operand.vmem [shape: bf16[8,72], index: 5, kind: input, shape index: {}]   ;;  %s1937_s6 = inlined_call_operand.vmem [shape: f32[8,2], index: 6, kind: input, shape index: {}]   ;;  %s1938_s7 = inlined_call_operand.hbm [shape: f32[8,512], index: 7, kind: output, shape index: {}]  }
   0x1   :  { %13 = vsyncpa [#allocation6], 0 }
   0x2   :  { %14 = vsyncpa [#allocation4], 0  ;;  %s1240_s24 = smov [#allocation5]   ;;  %s1146_s28 = scalar_lea.hbm %s1933_s2, 4096 }
   0x3   :  { %s32_s25 = sshll.u32 %s1240_s24, 4  ;;  %p1147_p0 = scmp.ne.s32.totalorder %s1933_s2, %s1146_s28  ;;  %s33_s25 = int_to_ptr.vmem [resolvable:$true] %s32_s25 }
   0x4   :  { %p1150_p1 = scmp.lt.u32.totalorder %s1146_s28, %s1933_s2 }
   0x6   :  { %p1152_p2 = pnand %p1150_p1, %p1147_p0 }
   0x8   :  { %1155 = shalt.err (!%p1152_p2)
}
   0x9   :  { %s1156_s10 = scalar_lea.vmem %s33_s25, 4096  ;;  %p1161_p4 = scmp.lt.s32.totalorder %s33_s25, %s33_s25 }
   0xa   :  { %p1157_p3 = scmp.ne.s32.totalorder %s33_s25, %s1156_s10  ;;  %p1162_p5 = scmp.lt.s32.totalorder %s1156_s10, %s1156_s10 }
   0xc   :  { %p1163_p6 = por %p1162_p5, %p1161_p4 }
   0xe   :  { %p1164_p7 = pnand %p1163_p6, %p1157_p3 }
  0x10   :  { %1167 = shalt.err (!%p1164_p7)
}
  0x11   :  { %s1241_s11 = smov 256   ;;  %s1242_s12 = smov 16  }
  0x12   :  { %38 = dma.hbm_to_vmem [thread:$0]  %s1933_s2, 4096, %s33_s25, [#allocation6], %s1241_s11, %s1241_s11, %s1242_s12  }
  0x13   :  { %s1243_s15 = smov [#allocation2]   ;;  %s1244_s17 = smov [#allocation7]  }
  0x14   :  { %s23_s16 = sshll.u32 %s1243_s15, 4  ;;  %s45_s18 = sshll.u32 %s1244_s17, 4  ;;  %s24_s16 = int_to_ptr.vmem [resolvable:$true] %s23_s16  ;;  %s46_s18 = int_to_ptr.vmem [resolvable:$true] %s45_s18 }
  0x15   :  { %s1168_s21 = scalar_lea.hbm %s1932_s1, 256 }
  0x16   :  { %p1169_p8 = scmp.ne.s32.totalorder %s1932_s1, %s1168_s21  ;;  %p1172_p9 = scmp.lt.u32.totalorder %s1168_s21, %s1932_s1 }
  0x18   :  { %p1174_p10 = pnand %p1172_p9, %p1169_p8 }
  0x1a   :  { %1177 = shalt.err (!%p1174_p10)
}
  0x1b   :  { %s1178_s2 = scalar_lea.vmem %s24_s16, 256  ;;  %p1183_p12 = scmp.lt.s32.totalorder %s24_s16, %s24_s16 }
  0x1c   :  { %p1179_p11 = scmp.ne.s32.totalorder %s24_s16, %s1178_s2  ;;  %p1184_p13 = scmp.lt.s32.totalorder %s1178_s2, %s1178_s2 }
  0x1e   :  { %p1185_p0 = por %p1184_p13, %p1183_p12 }
  0x20   :  { %p1186_p1 = pnand %p1185_p0, %p1179_p11 }
  0x22   :  { %1189 = shalt.err (!%p1186_p1)
}
  0x23   :  { %26 = dma.hbm_to_vmem [thread:$0]  %s1932_s1, 256, %s24_s16, [#allocation3]  }
  0x24   :  { %s1190_s30 = scalar_lea.hbm %s1934_s3, 512 }
  0x25   :  { %p1191_p2 = scmp.ne.s32.totalorder %s1934_s3, %s1190_s30  ;;  %p1194_p3 = scmp.lt.u32.totalorder %s1190_s30, %s1934_s3 }
  0x27   :  { %p1196_p4 = pnand %p1194_p3, %p1191_p2 }
  0x29   :  { %1199 = shalt.err (!%p1196_p4)
}
  0x2a   :  { %s1200_s13 = scalar_lea.vmem %s46_s18, 512  ;;  %p1205_p6 = scmp.lt.s32.totalorder %s46_s18, %s46_s18 }
  0x2b   :  { %p1201_p5 = scmp.ne.s32.totalorder %s46_s18, %s1200_s13  ;;  %p1206_p7 = scmp.lt.s32.totalorder %s1200_s13, %s1200_s13 }
  0x2d   :  { %p1207_p8 = por %p1206_p7, %p1205_p6 }
  0x2f   :  { %p1208_p9 = pnand %p1207_p8, %p1201_p5 }
  0x31   :  { %1211 = shalt.err (!%p1208_p9)
}
  0x32   :  { %48 = dma.hbm_to_vmem [thread:$0]  %s1934_s3, 512, %s46_s18, [#allocation6]  }
  0x33   :  { %1234 = dma.done.wait [#allocation3], 256  }
  0x34   :  { %1235 = vsyncadd [#allocation3], 4294967040 }
  0x35   :  { %1236 = dma.done.wait [#allocation6], 4608  }
  0x36   :  { %1237 = vsyncadd [#allocation6], 4294962688  ;;  %v1939_v0 = vmov 0   ;;  %v1096_v1 = vld [vmem:[#allocation5 + $0x4] ss:$16 sps:$4 sm:$0xff]   ;;  %vm368_vm0 = vcmask 1043456   ;;  %v381_v56 = vlaneseq }
  0x37   :  { %298 = vmatprep.mubr.bf16.mxu0 %v1939_v0  ;;  %339 = vmatprep.mubr.bf16.mxu1 %v1939_v0  ;;  %v1098_v2 = vld [vmem:[#allocation5 + $0xc] ss:$16 sps:$4 sm:$0xff]   ;;  %v1100_v3 = vld [vmem:[#allocation5] ss:$16 sps:$4 sm:$0xff]   ;;  %v1101_v4 = vld [vmem:[#allocation5 + $0x8] ss:$16 sps:$4 sm:$0xff]  }
  0x38   :  { %1094 = vset.pattern.permute.xlu0 %v1939_v0  ;;  %266 = vmatprep.subr.bf16.mxu0 %v1096_v1  ;;  %v1102_v5 = vld [vmem:[#allocation5 + $0x24] ss:$16 sps:$4 sm:$0xff]   ;;  %v1104_v6 = vld [vmem:[#allocation5 + $0x2c] ss:$16 sps:$4 sm:$0xff]   ;;  %v1106_v7 = vld [vmem:[#allocation5 + $0x20] ss:$16 sps:$4 sm:$0xff]  }
  0x39   :  { %307 = vmatprep.subr.bf16.mxu1 %v1098_v2  ;;  %267 = vmatpush1.bf16.msra.mxu0 %v1100_v3  ;;  %v1107_v8 = vld [vmem:[#allocation5 + $0x28] ss:$16 sps:$4 sm:$0xff]   ;;  %v1108_v9 = vld [vmem:[#allocation5 + $0x44] ss:$16 sps:$4 sm:$0xff]   ;;  %v1110_v10 = vld [vmem:[#allocation5 + $0x4c] ss:$16 sps:$4 sm:$0xff]  }
  0x3a   :  { %308 = vmatpush1.bf16.msra.mxu1 %v1101_v4  ;;  %268 = vmatprep.subr.bf16.mxu0 %v1102_v5  ;;  %v1112_v11 = vld [vmem:[#allocation5 + $0x40] ss:$16 sps:$4 sm:$0xff]   ;;  %v1113_v12 = vld [vmem:[#allocation5 + $0x48] ss:$16 sps:$4 sm:$0xff]   ;;  %v1114_v13 = vld [vmem:[#allocation5 + $0x64] ss:$16 sps:$4 sm:$0xff]  }
  0x3b   :  { %309 = vmatprep.subr.bf16.mxu1 %v1104_v6  ;;  %v1116_v14 = vld [vmem:[#allocation5 + $0x6c] ss:$16 sps:$4 sm:$0xff]   ;;  %v1118_v15 = vld [vmem:[#allocation5 + $0x60] ss:$16 sps:$4 sm:$0xff]   ;;  %v1119_v16 = vld [vmem:[#allocation5 + $0x68] ss:$16 sps:$4 sm:$0xff]  }
  0x3c   :  { %v1120_v17 = vld [vmem:[#allocation5 + $0x84] ss:$16 sps:$4 sm:$0xff]   ;;  %v1122_v18 = vld [vmem:[#allocation5 + $0x8c] ss:$16 sps:$4 sm:$0xff]   ;;  %v1124_v19 = vld [vmem:[#allocation5 + $0x80] ss:$16 sps:$4 sm:$0xff]  }
  0x3d   :  { %269 = vmatpush1.bf16.msra.mxu0 %v1106_v7  ;;  %v1125_v20 = vld [vmem:[#allocation5 + $0x88] ss:$16 sps:$4 sm:$0xff]   ;;  %v1126_v21 = vld [vmem:[#allocation5 + $0xa4] ss:$16 sps:$4 sm:$0xff]   ;;  %v1128_v22 = vld [vmem:[#allocation5 + $0xac] ss:$16 sps:$4 sm:$0xff]  }
  0x3e   :  { %310 = vmatpush1.bf16.msra.mxu1 %v1107_v8  ;;  %270 = vmatprep.subr.bf16.mxu0 %v1108_v9  ;;  %v1130_v23 = vld [vmem:[#allocation5 + $0xa0] ss:$16 sps:$4 sm:$0xff]   ;;  %v1131_v24 = vld [vmem:[#allocation5 + $0xa8] ss:$16 sps:$4 sm:$0xff]   ;;  %v1132_v25 = vld [vmem:[#allocation5 + $0xc4] ss:$16 sps:$4 sm:$0xff]  }
  0x3f   :  { %311 = vmatprep.subr.bf16.mxu1 %v1110_v10  ;;  %v1134_v26 = vld [vmem:[#allocation5 + $0xcc] ss:$16 sps:$4 sm:$0xff]   ;;  %v1136_v27 = vld [vmem:[#allocation5 + $0xc0] ss:$16 sps:$4 sm:$0xff]   ;;  %v1137_v28 = vld [vmem:[#allocation5 + $0xc8] ss:$16 sps:$4 sm:$0xff]  }
  0x40   :  { %v1138_v29 = vld [vmem:[#allocation5 + $0xe4] ss:$16 sps:$4 sm:$0xff]   ;;  %v1140_v30 = vld [vmem:[#allocation5 + $0xec] ss:$16 sps:$4 sm:$0xff]   ;;  %v1142_v31 = vld [vmem:[#allocation5 + $0xe0] ss:$16 sps:$4 sm:$0xff]  }
  0x41   :  { %271 = vmatpush1.bf16.msra.mxu0 %v1112_v11  ;;  %v1143_v32 = vld [vmem:[#allocation5 + $0xe8] ss:$16 sps:$4 sm:$0xff]   ;;  %v65_v33 = vld [vmem:[%s1931_s0] sm:$0xf]  ;;  %s1246_s0 = smov 17   ;;  %s1247_s16 = smov 15  }
  0x42   :  { %312 = vmatpush1.bf16.msra.mxu1 %v1113_v12  ;;  %272 = vmatprep.subr.bf16.mxu0 %v1114_v13  ;;  %v105_v34 = vpack.c.bf16 %v65_v33, %v65_v33  ;;  %v348_v36 = vld [vmem:[#allocation2] sm:$0xff]  ;;  %v349_v38 = vld [vmem:[#allocation2 + $0x8] sm:$0xff]  ;;  %s1248_s17 = smov 1   ;;  %s1249_s18 = smov 127   ;;  %v1426_v59 = vshrl.u32 %v381_v56, 7  ;;  %v1428_v60 = vand.u32 127, %v381_v56 }
  0x43   :  { %313 = vmatprep.subr.bf16.mxu1 %v1116_v14  ;;  %v353_v40 = vcombine.high %v349_v38, %v349_v38  ;;  %v352_v52 = vcombine.high %v348_v36, %v348_v36  ;;  %s1250_s19 = smov 113   ;;  %s1251_s20 = smov 112   ;;  %v1419_v55 = vld [vmem:[%s1937_s6] sm:$0xff]  ;;  %v1437_v1 = vld [vmem:[#allocation7 + $0x18] sm:$0xff]  ;;  %vm664_vm9 = vcmask 588800  }
  0x44   :  { %s1252_s21 = smov 111   ;;  %1952 = vst [vmem:[#allocation12_spill] sm:$0xff] %v1419_v55  ;;  %v1435_v63 = vsub.s32 0, %v1426_v59  ;;  %vm383_vm1 = vcmp.lt.s32.totalorder %v1428_v60, 17  ;;  %v423_v3 = vsub.s32 1, %v1426_v59  ;;  %vm416_vm2 = vcmp.lt.s32.totalorder %v1428_v60, 16 }
  0x45   :  { %273 = vmatpush1.bf16.msra.mxu0 %v1118_v15  ;;  %vm449_vm3 = vcmp.lt.s32.totalorder %v1428_v60, 15  ;;  %v522_v33 = vsub.s32 4, %v1426_v59  ;;  %vm482_vm4 = vcmp.lt.s32.totalorder %v1428_v60, 1  ;;  %vm515_vm5 = vcmp.lt.s32.totalorder %v1428_v60, 127 }
  0x46   :  { %314 = vmatpush1.bf16.msra.mxu1 %v1119_v16  ;;  %274 = vmatprep.subr.bf16.mxu0 %v1120_v17  ;;  %v1443_v5 = vrot.slane %v1437_v1, %v1435_v63  ;;  %v1446_v6 = vrot.slane %v1437_v1, %v423_v3  ;;  %vm548_vm6 = vcmp.lt.s32.totalorder %v1428_v60, 113  ;;  %vm581_vm7 = vcmp.lt.s32.totalorder %v1428_v60, 112 }
  0x47   :  { %315 = vmatprep.subr.bf16.mxu1 %v1122_v18  ;;  %vm614_vm8 = vcmp.lt.s32.totalorder %v1428_v60, 111 }
  0x48   :  { %1953 = vst [vmem:[#allocation13_spill] sm:$0xff] %v1443_v5  ;;  %1954 = vst [vmem:[#allocation14_spill] sm:$0xff] %v1446_v6 }
  0x49   :  { %275 = vmatpush1.bf16.msra.mxu0 %v1124_v19 }
  0x4a   :  { %316 = vmatpush1.bf16.msra.mxu1 %v1125_v20  ;;  %276 = vmatprep.subr.bf16.mxu0 %v1126_v21 }
  0x4b   :  { %317 = vmatprep.subr.bf16.mxu1 %v1128_v22  ;;  %v1473_v22 = vld [vmem:[#allocation7] sm:$0xff] }
  0x4d   :  { %277 = vmatpush1.bf16.msra.mxu0 %v1130_v23  ;;  %v1475_v23 = vld [vmem:[#allocation7 + $0x8] sm:$0xff] }
  0x4e   :  { %318 = vmatpush1.bf16.msra.mxu1 %v1131_v24  ;;  %278 = vmatprep.subr.bf16.mxu0 %v1132_v25  ;;  %v1477_v24 = vld [vmem:[#allocation7 + $0x10] sm:$0xff]  ;;  %v456_v25 = vsub.s32 2, %v1426_v59 }
  0x4f   :  { %319 = vmatprep.subr.bf16.mxu1 %v1134_v26  ;;  %v489_v26 = vsub.s32 3, %v1426_v59 }
  0x51   :  { %279 = vmatpush1.bf16.msra.mxu0 %v1136_v27  ;;  %v1483_v27 = vrot.slane %v1473_v22, %v1435_v63 }
  0x52   :  { %320 = vmatpush1.bf16.msra.mxu1 %v1137_v28  ;;  %280 = vmatprep.subr.bf16.mxu0 %v1138_v29  ;;  %v1486_v28 = vrot.slane %v1475_v23, %v423_v3 }
  0x53   :  { %321 = vmatprep.subr.bf16.mxu1 %v1140_v30  ;;  %1955 = vst [vmem:[#allocation15_spill] sm:$0xff] %v1483_v27 }
  0x54   :  { %1956 = vst [vmem:[#allocation16_spill] sm:$0xff] %v1486_v28 }
  0x55   :  { %281 = vmatpush1.bf16.msra.mxu0 %v1142_v31  ;;  %v1493_v31 = vrot.slane %v1477_v24, %v423_v3 }
  0x56   :  { %322 = vmatpush1.bf16.msra.mxu1 %v1143_v32  ;;  %v1496_v32 = vrot.slane %v1473_v22, %v423_v3 }
  0x57   :  { %1957 = vst [vmem:[#allocation17_spill] sm:$0xff] %v1493_v31 }
  0x58   :  { %299 = vmatmul.mubr.bf16.vlgmr.msra.gmra.mrb[0].mxu0 %v105_v34  ;;  %1958 = vst [vmem:[#allocation18_spill] sm:$0xff] %v1496_v32 }
  0x59   :  { %340 = vmatmul.mubr.bf16.vlgmr.msra.gmra.mrb[0].mxu1 %v105_v34  ;;  %712 = vmatprep.mubr.bf16.mxu0 %v1939_v0  ;;  %v1501_v34 = vrot.slane %v1475_v23, %v456_v25 }
  0x5a   :  { %753 = vmatprep.mubr.bf16.mxu1 %v1939_v0  ;;  %v1595_v0 = vsub.s32 7, %v1426_v59 }
  0x5b   :  { %1959 = vst [vmem:[#allocation19_spill] sm:$0xff] %v1501_v34 }
 0x12b   :  { %v300_v35 = vpop.f32.mrb[0].mxu0 }
 0x12c   :  { %v341_v37 = vpop.f32.mrb[0].mxu1  ;;  %v360_v39 = vrot.slane %v300_v35, 4  ;;  %v302_v42 = vpop.f32.mrb[1].mxu0  ;;  %v1504_v35 = vrot.slane %v1477_v24, %v456_v25 }
 0x12d   :  { %v362_v41 = vrot.slane %v341_v37, 4  ;;  %v343_v43 = vpop.f32.mrb[1].mxu1  ;;  %v304_v44 = vpop.f32.mrb[2].mxu0  ;;  %v361_v53 = vrot.slane %v302_v42, 4  ;;  %v555_v37 = vsub.s32 5, %v1426_v59  ;;  %v1524_v42 = vrot.slane %v1437_v1, %v489_v26 }
 0x12e   :  { %v363_v45 = vrot.slane %v343_v43, 4  ;;  %v345_v46 = vpop.f32.mrb[2].mxu1  ;;  %v1341_v47 = vsel %vm368_vm0, %v348_v36, %v360_v39  ;;  %v305_v49 = vpop.f32.mrb[3].mxu0  ;;  %v1507_v36 = vrot.slane %v1473_v22, %v456_v25  ;;  %v1515_v39 = vrot.slane %v1475_v23, %v489_v26 }
 0x12f   :  { %v1344_v48 = vsel %vm368_vm0, %v349_v38, %v362_v41  ;;  %v346_v50 = vpop.f32.mrb[3].mxu1  ;;  %373 = vrot.lane.b32.xlu0 %v1341_v47, %s1246_s0  ;;  %v1358_v54 = vsel %vm368_vm0, %v352_v52, %v361_v53  ;;  %v1511_v38 = vrot.slane %v1437_v1, %v456_v25  ;;  %v1521_v41 = vrot.slane %v1473_v22, %v489_v26 }
 0x130   :  { %377 = vrot.lane.b32.xlu1 %v1344_v48, %s1246_s0  ;;  %v1351_v51 = vsel %vm368_vm0, %v353_v40, %v363_v45  ;;  %1960 = vst [vmem:[#allocation20_spill] sm:$0xff] %v1515_v39  ;;  %v1518_v40 = vrot.slane %v1477_v24, %v489_v26  ;;  %1961 = vst [vmem:[#allocation21_spill] sm:$0xff] %v1524_v42  ;;  %v588_v45 = vsub.s32 6, %v1426_v59 }
 0x131   :  { %v1531_v46 = vrot.slane %v1473_v22, %v522_v33  ;;  %v1534_v49 = vrot.slane %v1475_v23, %v522_v33  ;;  %v1537_v50 = vrot.slane %v1477_v24, %v522_v33  ;;  %v1540_v52 = vrot.slane %v1437_v1, %v522_v33 }
 0x132   :  { %v1543_v53 = vrot.slane %v1473_v22, %v555_v37  ;;  %v1546_v56 = vrot.slane %v1475_v23, %v555_v37  ;;  %v1549_v3 = vrot.slane %v1477_v24, %v555_v37  ;;  %v1583_v33 = vrot.slane %v1473_v22, %v588_v45 }
 0x133   :  { %408 = vrot.lane.b32.xlu0 %v1341_v47, %s1242_s12 }
 0x134   :  { %379 = vrot.lane.b32.xlu1 %v1351_v51, %s1246_s0  ;;  %1962 = vst [vmem:[#allocation22_spill] sm:$0xff] %v1543_v53 }
 0x137   :  { %412 = vrot.lane.b32.xlu0 %v1344_v48, %s1242_s12 }
 0x138   :  { %410 = vrot.lane.b32.xlu1 %v1358_v54, %s1242_s12 }
 0x13b   :  { %441 = vrot.lane.b32.xlu0 %v1341_v47, %s1247_s16 }
 0x13c   :  { %414 = vrot.lane.b32.xlu1 %v1351_v51, %s1242_s12 }
 0x13f   :  { %445 = vrot.lane.b32.xlu0 %v1344_v48, %s1247_s16 }
 0x140   :  { %443 = vrot.lane.b32.xlu1 %v1358_v54, %s1247_s16 }
 0x143   :  { %474 = vrot.lane.b32.xlu0 %v1341_v47, %s1248_s17 }
 0x144   :  { %447 = vrot.lane.b32.xlu1 %v1351_v51, %s1247_s16 }
 0x147   :  { %478 = vrot.lane.b32.xlu0 %v1344_v48, %s1248_s17 }
 0x148   :  { %476 = vrot.lane.b32.xlu1 %v1358_v54, %s1248_s17 }
 0x14b   :  { %507 = vrot.lane.b32.xlu0 %v1341_v47, %s1249_s18 }
 0x14c   :  { %480 = vrot.lane.b32.xlu1 %v1351_v51, %s1248_s17 }
 0x14f   :  { %511 = vrot.lane.b32.xlu0 %v1344_v48, %s1249_s18 }
 0x150   :  { %509 = vrot.lane.b32.xlu1 %v1358_v54, %s1249_s18 }
 0x153   :  { %540 = vrot.lane.b32.xlu0 %v1341_v47, %s1250_s19 }
 0x154   :  { %513 = vrot.lane.b32.xlu1 %v1351_v51, %s1249_s18 }
 0x157   :  { %544 = vrot.lane.b32.xlu0 %v1344_v48, %s1250_s19 }
 0x158   :  { %542 = vrot.lane.b32.xlu1 %v1358_v54, %s1250_s19 }
 0x15b   :  { %375 = vrot.lane.b32.xlu0 %v1358_v54, %s1246_s0 }
 0x15c   :  { %546 = vrot.lane.b32.xlu1 %v1351_v51, %s1250_s19 }
 0x15f   :  { %573 = vrot.lane.b32.xlu0 %v1341_v47, %s1251_s20 }
 0x160   :  { %575 = vrot.lane.b32.xlu1 %v1358_v54, %s1251_s20 }
 0x163   :  { %577 = vrot.lane.b32.xlu0 %v1344_v48, %s1251_s20 }
 0x164   :  { %579 = vrot.lane.b32.xlu1 %v1351_v51, %s1251_s20 }
 0x167   :  { %606 = vrot.lane.b32.xlu0 %v1341_v47, %s1252_s21 }
 0x168   :  { %608 = vrot.lane.b32.xlu1 %v1358_v54, %s1252_s21 }
 0x16b   :  { %610 = vrot.lane.b32.xlu0 %v1344_v48, %s1252_s21 }
 0x16c   :  { %612 = vrot.lane.b32.xlu1 %v1351_v51, %s1252_s21 }
 0x16f   :  { %661 = vperm.xlu0 %1094, %v1419_v55  }
 0x1a1   :  { %v1424_v58 = vpop.permute.xlu0 %373 }
 0x1a2   :  { %v1422_v57 = vpop.permute.xlu1 %377 }
 0x1a5   :  { %v1432_v62 = vpop.permute.xlu0 %408 }
 0x1a6   :  { %v1430_v61 = vpop.permute.xlu1 %379 }
 0x1a7   :  { %v384_v7 = vsel %vm383_vm1, %v1422_v57, %v1430_v61 }
 0x1a8   :  { %v407_v11 = vmul.f32 %v1443_v5, %v384_v7  ;;  %v1552_v7 = vrot.slane %v1437_v1, %v555_v37  ;;  %v1586_v37 = vrot.slane %v1437_v1, %v588_v45 }
 0x1a9   :  { %v413_v2 = vpop.permute.xlu0 %412 }
 0x1aa   :  { %v411_v4 = vpop.permute.xlu1 %410 }
 0x1ad   :  { %v1453_v8 = vpop.permute.xlu0 %441 }
 0x1ae   :  { %v415_v9 = vpop.permute.xlu1 %414 }
 0x1af   :  { %v417_v10 = vsel %vm416_vm2, %v413_v2, %v415_v9  ;;  %v420_v25 = vsel %vm416_vm2, %v415_v9, %v1432_v62  ;;  %v1592_v9 = vrot.slane %v1477_v24, %v588_v45 }
 0x1b0   :  { %v440_v12 = vmul.f32 %v1446_v6, %v417_v10  ;;  %v387_v10 = vsel %vm383_vm1, %v1430_v61, %v1424_v58  ;;  %v437_v53 = vmul.f32 %v1496_v32, %v420_v25 }
 0x1b1   :  { %v1459_v13 = vpop.permute.xlu0 %445  ;;  %v404_v6 = vmul.f32 %v1483_v27, %v387_v10 }
 0x1b2   :  { %v1461_v14 = vpop.permute.xlu1 %443  ;;  %v642_v15 = vpack.c.bf16 %v440_v12, %v407_v11  ;;  %v418_v11 = vsel %vm416_vm2, %v411_v4, %v413_v2  ;;  %v419_v12 = vsel %vm416_vm2, %v1432_v62, %v411_v4  ;;  %v1580_v4 = vrot.slane %v1477_v24, %v1435_v63 }
 0x1b3   :  { %v452_v61 = vsel %vm449_vm3, %v1453_v8, %v1461_v14  ;;  %v1589_v62 = vrot.slane %v1475_v23, %v588_v45  ;;  %v439_v5 = vmul.f32 %v1493_v31, %v418_v11  ;;  %v451_v59 = vsel %vm449_vm3, %v1461_v14, %v1459_v13 }
 0x1b4   :  { %721 = vmatprep.subr.bf16.mxu1 %v642_v15  ;;  %v1565_v15 = vrot.slane %v1475_v23, %v1435_v63  ;;  %v438_v63 = vmul.f32 %v1486_v28, %v419_v12  ;;  %v471_v45 = vmul.f32 %v1501_v34, %v452_v61 }
 0x1b5   :  { %v1463_v16 = vpop.permute.xlu0 %474 }
 0x1b6   :  { %v1465_v17 = vpop.permute.xlu1 %447 }
 0x1b7   :  { %v450_v11 = vsel %vm449_vm3, %v1459_v13, %v1465_v17 }
 0x1b8   :  { %v473_v27 = vmul.f32 %v1511_v38, %v450_v11 }
 0x1b9   :  { %v1467_v18 = vpop.permute.xlu0 %478 }
 0x1ba   :  { %v1469_v19 = vpop.permute.xlu1 %476 }
 0x1bb   :  { %v485_v10 = vsel %vm482_vm4, %v1463_v16, %v1469_v19  ;;  %v484_v12 = vsel %vm482_vm4, %v1469_v19, %v1467_v18  ;;  %v453_v19 = vsel %vm449_vm3, %v1465_v17, %v1453_v8 }
 0x1bc   :  { %v505_v31 = vmul.f32 %v1518_v40, %v484_v12 }
 0x1bd   :  { %v1471_v20 = vpop.permute.xlu0 %507 }
 0x1be   :  { %v481_v21 = vpop.permute.xlu1 %480 }
 0x1bf   :  { %v483_v55 = vsel %vm482_vm4, %v1467_v18, %v481_v21  ;;  %v486_v14 = vsel %vm482_vm4, %v481_v21, %v1463_v16  ;;  %v504_v21 = vmul.f32 %v1515_v39, %v485_v10  ;;  %v639_v39 = vpack.c.bf16 %v437_v53, %v404_v6 }
 0x1c0   :  { %v506_v32 = vmul.f32 %v1524_v42, %v483_v55 }
 0x1c1   :  { %v1488_v29 = vpop.permute.xlu0 %511 }
 0x1c2   :  { %v1490_v30 = vpop.permute.xlu1 %509  ;;  %v646_v12 = vpack.c.bf16 %v506_v32, %v473_v27 }
 0x1c3   :  { %v517_v25 = vsel %vm515_vm5, %v1490_v30, %v1488_v29  ;;  %v518_v11 = vsel %vm515_vm5, %v1471_v20, %v1490_v30 }
 0x1c4   :  { %v537_v28 = vmul.f32 %v1534_v49, %v517_v25  ;;  %v536_v27 = vmul.f32 %v1531_v46, %v518_v11 }
 0x1c5   :  { %v1527_v43 = vpop.permute.xlu0 %540 }
 0x1c6   :  { %v514_v44 = vpop.permute.xlu1 %513 }
 0x1c7   :  { %v519_v13 = vsel %vm515_vm5, %v514_v44, %v1471_v20 }
 0x1c8   :  { %v539_v8 = vmul.f32 %v1540_v52, %v519_v13 }
 0x1c9   :  { %v1574_v26 = vpop.permute.xlu0 %544 }
 0x1ca   :  { %v1576_v2 = vpop.permute.xlu1 %542 }
 0x1cb   :  { %v550_v53 = vsel %vm548_vm6, %v1576_v2, %v1574_v26 }
 0x1cd   :  { %v376_v34 = vpop.permute.xlu0 %375 }
 0x1ce   :  { %v547_v61 = vpop.permute.xlu1 %546  ;;  %v385_v18 = vsel %vm383_vm1, %v376_v34, %v1422_v57  ;;  %v386_v16 = vsel %vm383_vm1, %v1424_v58, %v376_v34  ;;  %v503_v57 = vmul.f32 %v1521_v41, %v486_v14  ;;  %v516_v58 = vsel %vm515_vm5, %v1488_v29, %v514_v44 }
 0x1cf   :  { %v405_v55 = vmul.f32 %v1565_v15, %v386_v16  ;;  %v406_v42 = vmul.f32 %v1580_v4, %v385_v18  ;;  %v472_v18 = vmul.f32 %v1504_v35, %v451_v59  ;;  %v470_v14 = vmul.f32 %v1507_v36, %v453_v19 }
 0x1d0   :  { %v644_v29 = vpack.c.bf16 %v504_v21, %v471_v45  ;;  %v552_v44 = vsel %vm548_vm6, %v547_v61, %v1527_v43  ;;  %v549_v13 = vsel %vm548_vm6, %v1574_v26, %v547_v61  ;;  %v1694_v19 = vrot.slane %v1437_v1, %v1595_v0 }
 0x1d1   :  { %v641_v17 = vpack.c.bf16 %v439_v5, %v406_v42  ;;  %v574_v10 = vpop.permute.xlu0 %573  ;;  %v640_v16 = vpack.c.bf16 %v438_v63, %v405_v55  ;;  %v1663_v5 = vrot.slane %v1473_v22, %v1595_v0  ;;  %v645_v6 = vpack.c.bf16 %v505_v31, %v472_v18 }
 0x1d2   :  { %v576_v34 = vpop.permute.xlu1 %575  ;;  %v538_v42 = vmul.f32 %v1537_v50, %v516_v58  ;;  %v643_v20 = vpack.c.bf16 %v503_v57, %v470_v14  ;;  %v650_v22 = vpack.c.bf16 %v539_v8, %v1351_v51  ;;  %v648_v31 = vpack.c.bf16 %v537_v28, %v1358_v54 }
 0x1d3   :  { %680 = vmatprep.subr.bf16.mxu0 %v640_v16  ;;  %722 = vmatpush1.bf16.msra.mxu1 %v641_v17  ;;  %v572_v45 = vmul.f32 %v1552_v7, %v552_v44  ;;  %v584_v51 = vsel %vm581_vm7, %v574_v10, %v576_v34  ;;  %v551_v21 = vsel %vm548_vm6, %v1527_v43, %v1576_v2 }
 0x1d4   :  { %681 = vmatpush1.bf16.msra.mxu0 %v639_v39  ;;  %723 = vmatprep.subr.bf16.mxu1 %v646_v12  ;;  %v649_v25 = vpack.c.bf16 %v538_v42, %v1344_v48  ;;  %v570_v55 = vmul.f32 %v1546_v56, %v550_v53  ;;  %v647_v26 = vpack.c.bf16 %v536_v27, %v1341_v47  ;;  %v1963_v47 = vld [vmem:[#allocation22_spill] sm:$0xff]  ;;  %v1964_v53 = vmov 0  }
 0x1d5   :  { %682 = vmatprep.subr.bf16.mxu0 %v644_v29  ;;  %v578_v32 = vpop.permute.xlu0 %577  ;;  %v602_v61 = vmul.f32 %v1583_v33, %v584_v51  ;;  %v1708_v17 = vrot.slane %v1475_v23, %v1595_v0  ;;  %v571_v43 = vmul.f32 %v1549_v3, %v549_v13  ;;  %v569_v16 = vmul.f32 %v1963_v47, %v551_v21 }
 0x1d6   :  { %v580_v30 = vpop.permute.xlu1 %579  ;;  %v583_v59 = vsel %vm581_vm7, %v576_v34, %v578_v32 }
 0x1d7   :  { %v585_v39 = vsel %vm581_vm7, %v580_v30, %v574_v10  ;;  %v582_v63 = vsel %vm581_vm7, %v578_v32, %v580_v30  ;;  %v603_v28 = vmul.f32 %v1589_v62, %v583_v59  ;;  %724 = vmatpush1.bf16.msra.mxu1 %v645_v6  ;;  %v1714_v10 = vrot.slane %v1477_v24, %v1595_v0 }
 0x1d8   :  { %v605_v54 = vmul.f32 %v1586_v37, %v585_v39  ;;  %683 = vmatpush1.bf16.msra.mxu0 %v643_v20  ;;  %725 = vmatprep.subr.bf16.mxu1 %v650_v22  ;;  %v604_v57 = vmul.f32 %v1592_v9, %v582_v63  ;;  %v651_v23 = vpack.c.bf16 %v602_v61, %v569_v16 }
 0x1d9   :  { %684 = vmatprep.subr.bf16.mxu0 %v648_v31  ;;  %v607_v58 = vpop.permute.xlu0 %606  ;;  %v652_v34 = vpack.c.bf16 %v603_v28, %v570_v55  ;;  %v98_v31 = vld [vmem:[%s1935_s4] sm:$0xf] }
 0x1da   :  { %v609_v48 = vpop.permute.xlu1 %608  ;;  %v654_v8 = vpack.c.bf16 %v605_v54, %v572_v45  ;;  %v653_v18 = vpack.c.bf16 %v604_v57, %v571_v43  ;;  %v1965_v43 = vld [vmem:[#allocation12_spill] sm:$0xff] }
 0x1db   :  { %v617_v1 = vsel %vm614_vm8, %v607_v58, %v609_v48  ;;  %726 = vmatpush1.bf16.msra.mxu1 %v649_v25 }
 0x1dc   :  { %v635_v2 = vmul.f32 %v1663_v5, %v617_v1  ;;  %685 = vmatpush1.bf16.msra.mxu0 %v647_v26  ;;  %727 = vmatprep.subr.bf16.mxu1 %v654_v8  ;;  %v1253_v1 = vmov 1  }
 0x1dd   :  { %686 = vmatprep.subr.bf16.mxu0 %v652_v34  ;;  %v611_v12 = vpop.permute.xlu0 %610  ;;  %1095 = vset.pattern.permute.xlu0 %v1253_v1 }
 0x1de   :  { %v613_v11 = vpop.permute.xlu1 %612  ;;  %v616_v6 = vsel %vm614_vm8, %v609_v48, %v611_v12  ;;  %v655_v0 = vpack.c.bf16 %v635_v2, %v635_v2 }
 0x1df   :  { %v618_v14 = vsel %vm614_vm8, %v613_v11, %v607_v58  ;;  %v615_v29 = vsel %vm614_vm8, %v611_v12, %v613_v11  ;;  %v636_v42 = vmul.f32 %v1708_v17, %v616_v6  ;;  %728 = vmatpush1.bf16.msra.mxu1 %v653_v18 }
 0x1e0   :  { %v638_v24 = vmul.f32 %v1694_v19, %v618_v14  ;;  %v637_v44 = vmul.f32 %v1714_v10, %v615_v29  ;;  %687 = vmatpush1.bf16.msra.mxu0 %v651_v23  ;;  %v669_v32 = vsel %vm368_vm0, %v655_v0, 0 }
 0x1e1   :  { %v656_v27 = vpack.c.bf16 %v636_v42, %v636_v42  ;;  %v1966_v42 = vld [vmem:[#allocation16_spill] sm:$0xff] }
 0x1e2   :  { %v658_v20 = vpack.c.bf16 %v638_v24, %v638_v24  ;;  %v657_v30 = vpack.c.bf16 %v637_v44, %v637_v44 }
 0x1e3   :  { %1071 = vmatprep.subr.msk.bf16.mxu0 %vm368_vm0, %v656_v27 }
 0x1e4   :  { %1073 = vmatprep.subr.msk.bf16.mxu1 %vm368_vm0, %v658_v20  ;;  %v675_v22 = vsel %vm368_vm0, %v657_v30, 0  ;;  %689 = vmatpush1.bf16.msra.mxu0 %v669_v32 }
 0x1e5   :  { %730 = vmatpush1.bf16.msra.mxu1 %v675_v22 }
 0x1e7   :  { %1072 = vmatmul.mubr.msk.bf16.vlgmr.msra.gmra.mrb[4].mxu0 %vm664_vm9, %v98_v31 }
 0x1e8   :  { %1074 = vmatmul.mubr.msk.bf16.vlgmr.msra.gmra.mrb[4].mxu1 %vm664_vm9, %v98_v31  ;;  %965 = vmatprep.mubr.bf16.mxu0 %v1964_v53 }
 0x1e9   :  { %1006 = vmatprep.mubr.bf16.mxu1 %v1964_v53  ;;  %v1967_v53 = vld [vmem:[#allocation17_spill] sm:$0xff] }
 0x1ee   :  { %v662_v39 = vpop.permute.xlu0 %661 }
 0x2ba   :  { %v714_v59 = vpop.f32.mrb[4].mxu0 }
 0x2bb   :  { %v755_v63 = vpop.f32.mrb[4].mxu1  ;;  %v715_v51 = vadd.f32 %v714_v59, %v662_v39  ;;  %v716_v54 = vpop.f32.mrb[5].mxu0  ;;  %v1968_v59 = vld [vmem:[#allocation15_spill] sm:$0xff] }
 0x2bc   :  { %v756_v45 = vadd.f32 %v755_v63, %v662_v39  ;;  %v757_v28 = vpop.f32.mrb[5].mxu1  ;;  %v718_v25 = vpop.f32.mrb[6].mxu0  ;;  %v717_v57 = vadd.f32 %v716_v54, %v662_v39 }
 0x2bd   :  { %v759_v13 = vpop.f32.mrb[6].mxu1  ;;  %v1739_v55 = vmax.f32 %v715_v51, 0.0  ;;  %v719_v48 = vpop.f32.mrb[7].mxu0  ;;  %v758_v26 = vadd.f32 %v757_v28, %v662_v39  ;;  %v1969_v51 = vld [vmem:[#allocation13_spill] sm:$0xff]  ;;  %v1970_v28 = vld [vmem:[#allocation18_spill] sm:$0xff] }
 0x2be   :  { %v1737_v21 = vmax.f32 %v756_v45, 0.0  ;;  %v760_v58 = vpop.f32.mrb[7].mxu1  ;;  %v1745_v8 = vmax.f32 %v717_v57, 0.0  ;;  %v1971_v13 = vld [vmem:[#allocation14_spill] sm:$0xff] }
 0x2bf   :  { %766 = vrot.lane.b32.xlu1 %v1739_v55, %s1246_s0  ;;  %v1751_v61 = vmax.f32 %v758_v26, 0.0 }
 0x2c0   :  { %770 = vrot.lane.b32.xlu0 %v1737_v21, %s1246_s0 }
 0x2c3   :  { %768 = vrot.lane.b32.xlu1 %v1745_v8, %s1246_s0 }
 0x2c4   :  { %782 = vrot.lane.b32.xlu0 %v1739_v55, %s1242_s12 }
 0x2c7   :  { %772 = vrot.lane.b32.xlu1 %v1751_v61, %s1246_s0 }
 0x2c8   :  { %786 = vrot.lane.b32.xlu0 %v1737_v21, %s1242_s12 }
 0x2cb   :  { %784 = vrot.lane.b32.xlu1 %v1745_v8, %s1242_s12 }
 0x2cc   :  { %798 = vrot.lane.b32.xlu0 %v1739_v55, %s1247_s16 }
 0x2cf   :  { %788 = vrot.lane.b32.xlu1 %v1751_v61, %s1242_s12 }
 0x2d0   :  { %802 = vrot.lane.b32.xlu0 %v1737_v21, %s1247_s16 }
 0x2d3   :  { %800 = vrot.lane.b32.xlu1 %v1745_v8, %s1247_s16 }
 0x2d4   :  { %814 = vrot.lane.b32.xlu0 %v1739_v55, %s1248_s17 }
 0x2d7   :  { %804 = vrot.lane.b32.xlu1 %v1751_v61, %s1247_s16 }
 0x2d8   :  { %818 = vrot.lane.b32.xlu0 %v1737_v21, %s1248_s17 }
 0x2db   :  { %816 = vrot.lane.b32.xlu1 %v1745_v8, %s1248_s17 }
 0x2dc   :  { %830 = vrot.lane.b32.xlu0 %v1739_v55, %s1249_s18 }
 0x2df   :  { %820 = vrot.lane.b32.xlu1 %v1751_v61, %s1248_s17 }
 0x2e0   :  { %834 = vrot.lane.b32.xlu0 %v1737_v21, %s1249_s18 }
 0x2e3   :  { %832 = vrot.lane.b32.xlu1 %v1745_v8, %s1249_s18 }
 0x2e4   :  { %846 = vrot.lane.b32.xlu0 %v1739_v55, %s1250_s19 }
 0x2e7   :  { %836 = vrot.lane.b32.xlu1 %v1751_v61, %s1249_s18 }
 0x2e8   :  { %850 = vrot.lane.b32.xlu0 %v1737_v21, %s1250_s19 }
 0x2eb   :  { %848 = vrot.lane.b32.xlu1 %v1745_v8, %s1250_s19 }
 0x2ec   :  { %862 = vrot.lane.b32.xlu0 %v1739_v55, %s1251_s20 }
 0x2ef   :  { %852 = vrot.lane.b32.xlu1 %v1751_v61, %s1250_s19 }
 0x2f0   :  { %866 = vrot.lane.b32.xlu0 %v1737_v21, %s1251_s20 }
 0x2f3   :  { %864 = vrot.lane.b32.xlu1 %v1745_v8, %s1251_s20 }
 0x2f4   :  { %878 = vrot.lane.b32.xlu0 %v1739_v55, %s1252_s21 }
 0x2f7   :  { %868 = vrot.lane.b32.xlu1 %v1751_v61, %s1251_s20 }
 0x2f8   :  { %882 = vrot.lane.b32.xlu0 %v1737_v21, %s1252_s21 }
 0x2fb   :  { %880 = vrot.lane.b32.xlu1 %v1745_v8, %s1252_s21 }
 0x2fc   :  { %915 = vperm.xlu0 %1095, %v1965_v43  }
 0x2ff   :  { %884 = vrot.lane.b32.xlu1 %v1751_v61, %s1252_s21 }
 0x331   :  { %v767_v34 = vpop.permute.xlu1 %766 }
 0x332   :  { %v771_v2 = vpop.permute.xlu0 %770 }
 0x335   :  { %v769_v18 = vpop.permute.xlu1 %768 }
 0x336   :  { %v783_v16 = vpop.permute.xlu0 %782  ;;  %v776_v23 = vsel %vm383_vm1, %v767_v34, %v769_v18  ;;  %v775_v30 = vsel %vm383_vm1, %v769_v18, %v771_v2 }
 0x337   :  { %v779_v0 = vmul.f32 %v776_v23, %v1565_v15  ;;  %v780_v48 = vmul.f32 %v775_v30, %v1580_v4 }
 0x339   :  { %v773_v12 = vpop.permute.xlu1 %772 }
 0x33a   :  { %v787_v11 = vpop.permute.xlu0 %786  ;;  %v774_v20 = vsel %vm383_vm1, %v771_v2, %v773_v12  ;;  %v777_v27 = vsel %vm383_vm1, %v773_v12, %v767_v34 }
 0x33b   :  { %v778_v45 = vmul.f32 %v777_v27, %v1968_v59  ;;  %v781_v54 = vmul.f32 %v774_v20, %v1969_v51  ;;  %v1974_v59 = vld [vmem:[#allocation21_spill] sm:$0xff] }
 0x33d   :  { %v785_v29 = vpop.permute.xlu1 %784 }
 0x33e   :  { %v799_v14 = vpop.permute.xlu0 %798  ;;  %v792_v6 = vsel %vm416_vm2, %v783_v16, %v785_v29  ;;  %v791_v24 = vsel %vm416_vm2, %v785_v29, %v787_v11  ;;  %v1972_v29 = vld [vmem:[#allocation19_spill] sm:$0xff] }
 0x33f   :  { %v795_v44 = vmul.f32 %v792_v6, %v1966_v42  ;;  %v796_v39 = vmul.f32 %v791_v24, %v1967_v53 }
 0x341   :  { %v789_v22 = vpop.permute.xlu1 %788  ;;  %v895_v31 = vpack.c.bf16 %v795_v44, %v779_v0  ;;  %v896_v2 = vpack.c.bf16 %v796_v39, %v780_v48  ;;  %v1973_v0 = vld [vmem:[#allocation20_spill] sm:$0xff] }
 0x342   :  { %v803_v32 = vpop.permute.xlu0 %802  ;;  %v790_v15 = vsel %vm416_vm2, %v787_v11, %v789_v22  ;;  %v793_v63 = vsel %vm416_vm2, %v789_v22, %v783_v16 }
 0x343   :  { %v794_v25 = vmul.f32 %v793_v63, %v1970_v28  ;;  %v797_v57 = vmul.f32 %v790_v15, %v1971_v13  ;;  %933 = vmatprep.subr.bf16.mxu0 %v895_v31 }
 0x345   :  { %v894_v58 = vpack.c.bf16 %v794_v25, %v778_v45  ;;  %v801_v1 = vpop.permute.xlu1 %800  ;;  %v897_v43 = vpack.c.bf16 %v797_v57, %v781_v54 }
 0x346   :  { %v815_v26 = vpop.permute.xlu0 %814  ;;  %v808_v18 = vsel %vm449_vm3, %v799_v14, %v801_v1  ;;  %v807_v20 = vsel %vm449_vm3, %v801_v1, %v803_v32 }
 0x347   :  { %934 = vmatpush1.bf16.msra.mxu0 %v894_v58  ;;  %974 = vmatprep.subr.bf16.mxu1 %v897_v43  ;;  %v811_v4 = vmul.f32 %v808_v18, %v1972_v29 }
 0x348   :  { %975 = vmatpush1.bf16.msra.mxu1 %v896_v2 }
 0x349   :  { %v805_v16 = vpop.permute.xlu1 %804 }
 0x34a   :  { %v819_v34 = vpop.permute.xlu0 %818  ;;  %v806_v42 = vsel %vm449_vm3, %v803_v32, %v805_v16  ;;  %v809_v44 = vsel %vm449_vm3, %v805_v16, %v799_v14  ;;  %v812_v32 = vmul.f32 %v807_v20, %v1504_v35 }
 0x34b   :  { %v810_v15 = vmul.f32 %v809_v44, %v1507_v36  ;;  %v813_v63 = vmul.f32 %v806_v42, %v1511_v38 }
 0x34d   :  { %v817_v12 = vpop.permute.xlu1 %816 }
 0x34e   :  { %v831_v11 = vpop.permute.xlu0 %830  ;;  %v824_v23 = vsel %vm482_vm4, %v815_v26, %v817_v12  ;;  %v823_v6 = vsel %vm482_vm4, %v817_v12, %v819_v34 }
 0x34f   :  { %v827_v24 = vmul.f32 %v824_v23, %v1973_v0  ;;  %v828_v31 = vmul.f32 %v823_v6, %v1518_v40 }
 0x351   :  { %v821_v30 = vpop.permute.xlu1 %820  ;;  %v899_v22 = vpack.c.bf16 %v827_v24, %v811_v4  ;;  %v900_v25 = vpack.c.bf16 %v828_v31, %v812_v32 }
 0x352   :  { %v835_v27 = vpop.permute.xlu0 %834  ;;  %v822_v53 = vsel %vm482_vm4, %v819_v34, %v821_v30  ;;  %v825_v39 = vsel %vm482_vm4, %v821_v30, %v815_v26 }
 0x353   :  { %v826_v14 = vmul.f32 %v825_v39, %v1521_v41  ;;  %v829_v45 = vmul.f32 %v822_v53, %v1974_v59  ;;  %935 = vmatprep.subr.bf16.mxu0 %v899_v22 }
 0x355   :  { %v898_v51 = vpack.c.bf16 %v826_v14, %v810_v15  ;;  %v833_v40 = vpop.permute.xlu1 %832  ;;  %v901_v28 = vpack.c.bf16 %v829_v45, %v813_v63 }
 0x356   :  { %v847_v54 = vpop.permute.xlu0 %846  ;;  %v839_v13 = vsel %vm515_vm5, %v833_v40, %v835_v27  ;;  %v840_v36 = vsel %vm515_vm5, %v831_v11, %v833_v40 }
 0x357   :  { %v842_v38 = vmul.f32 %v840_v36, %v1531_v46  ;;  %v843_v41 = vmul.f32 %v839_v13, %v1534_v49  ;;  %936 = vmatpush1.bf16.msra.mxu0 %v898_v51  ;;  %976 = vmatprep.subr.bf16.mxu1 %v901_v28 }
 0x358   :  { %977 = vmatpush1.bf16.msra.mxu1 %v900_v25 }
 0x359   :  { %v902_v35 = vpack.c.bf16 %v842_v38, %v1739_v55  ;;  %v837_v48 = vpop.permute.xlu1 %836  ;;  %v903_v58 = vpack.c.bf16 %v843_v41, %v1745_v8 }
 0x35a   :  { %v851_v57 = vpop.permute.xlu0 %850  ;;  %v838_v26 = vsel %vm515_vm5, %v835_v27, %v837_v48  ;;  %v841_v1 = vsel %vm515_vm5, %v837_v48, %v831_v11 }
 0x35b   :  { %v844_v43 = vmul.f32 %v838_v26, %v1537_v50  ;;  %v845_v46 = vmul.f32 %v841_v1, %v1540_v52  ;;  %937 = vmatprep.subr.bf16.mxu0 %v903_v58 }
 0x35c   :  { %938 = vmatpush1.bf16.msra.mxu0 %v902_v35 }
 0x35d   :  { %v904_v49 = vpack.c.bf16 %v844_v43, %v1737_v21  ;;  %v849_v55 = vpop.permute.xlu1 %848  ;;  %v905_v34 = vpack.c.bf16 %v845_v46, %v1751_v61 }
 0x35e   :  { %v863_v2 = vpop.permute.xlu0 %862  ;;  %v855_v18 = vsel %vm548_vm6, %v849_v55, %v851_v57  ;;  %v856_v50 = vsel %vm548_vm6, %v847_v54, %v849_v55 }
 0x35f   :  { %978 = vmatprep.subr.bf16.mxu1 %v905_v34  ;;  %v858_v12 = vmul.f32 %v856_v50, %v1963_v47  ;;  %v859_v61 = vmul.f32 %v855_v18, %v1546_v56 }
 0x360   :  { %979 = vmatpush1.bf16.msra.mxu1 %v904_v49 }
 0x361   :  { %v853_v16 = vpop.permute.xlu1 %852 }
 0x362   :  { %v867_v8 = vpop.permute.xlu0 %866  ;;  %v854_v6 = vsel %vm548_vm6, %v851_v57, %v853_v16  ;;  %v857_v0 = vsel %vm548_vm6, %v853_v16, %v847_v54 }
 0x363   :  { %v860_v47 = vmul.f32 %v854_v6, %v1549_v3 }
 0x365   :  { %v865_v11 = vpop.permute.xlu1 %864 }
 0x366   :  { %v871_v52 = vsel %vm581_vm7, %v865_v11, %v867_v8  ;;  %v872_v21 = vsel %vm581_vm7, %v863_v2, %v865_v11  ;;  %v879_v23 = vpop.permute.xlu0 %878 }
 0x367   :  { %v874_v29 = vmul.f32 %v872_v21, %v1583_v33  ;;  %v875_v4 = vmul.f32 %v871_v52, %v1589_v62  ;;  %v861_v33 = vmul.f32 %v857_v0, %v1552_v7 }
 0x369   :  { %v906_v24 = vpack.c.bf16 %v874_v29, %v858_v12  ;;  %v869_v42 = vpop.permute.xlu1 %868  ;;  %v907_v44 = vpack.c.bf16 %v875_v4, %v859_v61 }
 0x36a   :  { %v870_v20 = vsel %vm581_vm7, %v867_v8, %v869_v42  ;;  %v873_v56 = vsel %vm581_vm7, %v869_v42, %v863_v2  ;;  %v883_v30 = vpop.permute.xlu0 %882 }
 0x36b   :  { %v876_v62 = vmul.f32 %v870_v20, %v1592_v9  ;;  %v877_v27 = vmul.f32 %v873_v56, %v1586_v37  ;;  %939 = vmatprep.subr.bf16.mxu0 %v907_v44 }
 0x36c   :  { %940 = vmatpush1.bf16.msra.mxu0 %v906_v24 }
 0x36d   :  { %v908_v22 = vpack.c.bf16 %v876_v62, %v860_v47  ;;  %v881_v31 = vpop.permute.xlu1 %880  ;;  %v909_v53 = vpack.c.bf16 %v877_v27, %v861_v33 }
 0x36e   :  { %v887_v39 = vsel %vm614_vm8, %v881_v31, %v883_v30  ;;  %v888_v15 = vsel %vm614_vm8, %v879_v23, %v881_v31 }
 0x36f   :  { %v890_v3 = vmul.f32 %v888_v15, %v1663_v5  ;;  %v891_v7 = vmul.f32 %v887_v39, %v1708_v17  ;;  %980 = vmatprep.subr.bf16.mxu1 %v909_v53  ;;  %v99_v17 = vld [vmem:[%s1936_s5] sm:$0xf]  ;;  %s1254_s5 = smov [#allocation8]  }
 0x370   :  { %981 = vmatpush1.bf16.msra.mxu1 %v908_v22  ;;  %s1029_s26 = sshll.u32 %s1254_s5, 4  ;;  %s1030_s26 = int_to_ptr.vmem [resolvable:$true] %s1029_s26 }
 0x371   :  { %v910_v9 = vpack.c.bf16 %v890_v3, %v890_v3  ;;  %v911_v37 = vpack.c.bf16 %v891_v7, %v891_v7  ;;  %v885_v63 = vpop.permute.xlu1 %884  ;;  %s1212_s2 = scalar_lea.vmem %s1030_s26, 512  ;;  %p1217_p11 = scmp.lt.s32.totalorder %s1030_s26, %s1030_s26 }
 0x372   :  { %v886_v14 = vsel %vm614_vm8, %v883_v30, %v885_v63  ;;  %v889_v59 = vsel %vm614_vm8, %v885_v63, %v879_v23  ;;  %p1213_p10 = scmp.ne.s32.totalorder %s1030_s26, %s1212_s2  ;;  %p1218_p12 = scmp.lt.s32.totalorder %s1212_s2, %s1212_s2 }
 0x373   :  { %v892_v45 = vmul.f32 %v886_v14, %v1714_v10  ;;  %v893_v32 = vmul.f32 %v889_v59, %v1694_v19  ;;  %1075 = vmatprep.subr.msk.bf16.mxu0 %vm368_vm0, %v911_v37  ;;  %v922_v5 = vsel %vm368_vm0, %v910_v9, 0 }
 0x374   :  { %942 = vmatpush1.bf16.msra.mxu0 %v922_v5  ;;  %p1219_p13 = por %p1218_p12, %p1217_p11 }
 0x375   :  { %v912_v51 = vpack.c.bf16 %v892_v45, %v892_v45  ;;  %v913_v54 = vpack.c.bf16 %v893_v32, %v893_v32 }
 0x376   :  { %p1220_p0 = pnand %p1219_p13, %p1213_p10 }
 0x377   :  { %1077 = vmatprep.subr.msk.bf16.mxu1 %vm368_vm0, %v913_v54  ;;  %1076 = vmatmul.mubr.msk.bf16.vlgmr.msra.gmra.mrb[8].mxu0 %vm664_vm9, %v99_v17  ;;  %v928_v60 = vsel %vm368_vm0, %v912_v51, 0 }
 0x378   :  { %983 = vmatpush1.bf16.msra.mxu1 %v928_v60 }
 0x37b   :  { %1078 = vmatmul.mubr.msk.bf16.vlgmr.msra.gmra.mrb[8].mxu1 %vm664_vm9, %v99_v17  ;;  %v916_v19 = vpop.permute.xlu0 %915 }
 0x44a   :  { %v967_v10 = vpop.f32.mrb[8].mxu0 }
 0x44b   :  { %v969_v40 = vpop.f32.mrb[9].mxu0  ;;  %v968_v28 = vadd.f32 %v967_v10, %v916_v19 }
 0x44c   :  { %v971_v25 = vpop.f32.mrb[10].mxu0  ;;  %v970_v13 = vadd.f32 %v969_v40, %v916_v19 }
 0x44d   :  { %v1015_v36 = vmax.f32 %v968_v28, 0.0  ;;  %v972_v38 = vpop.f32.mrb[11].mxu0 }
 0x44e   :  { %v1016_v41 = vmax.f32 %v970_v13, 0.0  ;;  %v1008_v35 = vpop.f32.mrb[8].mxu1 }
 0x44f   :  { %1019 = vst [vmem:[#allocation8] sm:$0xff] %v1015_v36  ;;  %v1009_v57 = vadd.f32 %v1008_v35, %v916_v19  ;;  %v1010_v48 = vpop.f32.mrb[9].mxu1 }
 0x450   :  { %1020 = vst [vmem:[#allocation8 + $0x8] sm:$0xff] %v1016_v41  ;;  %v1011_v58 = vadd.f32 %v1010_v48, %v916_v19  ;;  %v1012_v26 = vpop.f32.mrb[10].mxu1 }
 0x451   :  { %v1017_v1 = vmax.f32 %v1009_v57, 0.0  ;;  %v1013_v43 = vpop.f32.mrb[11].mxu1 }
 0x452   :  { %v1018_v46 = vmax.f32 %v1011_v58, 0.0 }
 0x453   :  { %1021 = vst [vmem:[#allocation8 + $0x10] sm:$0xff] %v1017_v1 }
 0x454   :  { %1022 = vst [vmem:[#allocation8 + $0x18] sm:$0xff] %v1018_v46 }
 0x455   :  { %1223 = shalt.err (!%p1220_p0)
}
 0x456   :  { %s1224_s28 = scalar_lea.hbm %s1938_s7, 512 }
 0x457   :  { %p1225_p1 = scmp.ne.s32.totalorder %s1938_s7, %s1224_s28  ;;  %p1228_p2 = scmp.lt.u32.totalorder %s1224_s28, %s1938_s7 }
 0x459   :  { %p1230_p3 = pnand %p1228_p2, %p1225_p1 }
 0x45b   :  { %1233 = shalt.err (!%p1230_p3)
}
 0x45c   :  { %1032 = dma.vmem_to_hbm [thread:$0]  %s1030_s26, 512, %s1938_s7, [#allocation4]  }
 0x45d   :  { %1238 = dma.done.wait [#allocation4], 512  }
 0x45e   :  { %1239 = vsyncadd [#allocation4], 4294966784 }
 0x45f   :  { %1036 = vsyncpa [#allocation3], 1 }
 0x460   :  { %1037 = vsyncpa [#allocation6], 1 }
 0x461   :  { %1038 = vsyncpa [#allocation4], 1 }

</bundles_post_ra>
